<compile_context>
chip_gen: v5e
topology: v5e:2x2
jax: 0.10.0
libtpu: 0.0.40
codegen_flags: <defaults>
</compile_context>

<pallas_src>
import functools

import jax
import jax.numpy as jnp
from jax.experimental import pallas as pl
from jax.experimental.pallas import tpu as pltpu


# ---------------------------------------------------------------------------
# Small helpers
# ---------------------------------------------------------------------------
def _cdiv(a, b):
    return (a + b - 1) // b


def _round_up(v, m):
    return _cdiv(v, m) * m


def _sublane(dtype):
    # Native sublane packing of the second-to-last dim: 8 for 4-byte, 16 for
    # 2-byte (bf16), 32 for 1-byte dtypes.
    return {4: 8, 2: 16, 1: 32}.get(jnp.dtype(dtype).itemsize, 8)


def _vmem_capacity_bytes():
    """Per-TensorCore VMEM capacity (generation-aware), with a v7x-safe fallback."""
    try:
        cap = int(pltpu.get_tpu_info().vmem_capacity_bytes)
    except Exception:  # noqa: BLE001 - query not available; be conservative
        cap = 64 * 1024 * 1024
    return max(32 * 1024 * 1024, min(cap, 128 * 1024 * 1024))


def _pad_to(a, shape):
    pads = tuple((0, t - s) for s, t in zip(a.shape, shape))
    if all(p == 0 for _, p in pads):
        return a
    return jnp.pad(a, pads)


def _const_spec(shape, index_map, single_buffer):
    """BlockSpec for a grid-invariant operand.

    Buffered(1) avoids reserving a second (never used) VMEM buffer, halving the
    resident weight footprint; the DMA only happens once either way because the
    block index never changes."""
    if single_buffer and hasattr(pl, "Buffered"):
        return pl.BlockSpec(shape, index_map, pipeline_mode=pl.Buffered(1))
    return pl.BlockSpec(shape, index_map)


def _pick_tile_rows(n_rows, d, h_act, x_itemsize, weight_bytes, requested, sublane,
                    budget, min_grid_steps=4):
    """Largest sublane-aligned row tile that fits the per-core VMEM budget.

    `weight_bytes` is the resident (already single/double-buffer-adjusted) weight
    footprint per core; `h_act` is the hidden width seen by one grid step."""
    requested = max(sublane, _round_up(requested, sublane))
    # Keep >= min_grid_steps grid steps when there is enough work so v7x's two
    # TensorCores both get rows and the x/out DMA overlaps the MXU work.
    if n_rows > min_grid_steps * sublane:
        requested = min(requested, _round_up(_cdiv(n_rows, min_grid_steps), sublane))

    def tile_bytes(t):
        io = 2 * 2 * t * d * x_itemsize          # double-buffered x + out row tiles
        act = t * (h_act + 2 * d) * 4            # f32 hidden + f32 accum/residual
        return io + act

    tm = min(requested, _round_up(n_rows, sublane))
    while tm > sublane and weight_bytes + tile_bytes(tm) > budget:
        tm = max(sublane, _round_up(tm // 2, sublane))
    if weight_bytes + tile_bytes(tm) > budget:
        raise ValueError(
            "Adapter weights (%.1f MiB resident per TensorCore) plus the minimum row "
            "tile exceed the %.1f MiB per-core VMEM budget; reduce D/H or use a "
            "narrower weight dtype." % (weight_bytes / 2**20, budget / 2**20))
    return min(tm, n_rows)


# ---------------------------------------------------------------------------
# Kernels
# ---------------------------------------------------------------------------
def _adapter_kernel(x_ref, w1_ref, b1_ref, w2_ref, b2_ref, o_ref, *,
                    skip_connect, approximate_gelu):
    """Whole-hidden kernel: one row tile per grid step, weights fully resident."""
    x = x_ref[...]
    # Cast x to the weight dtype once so bf16 weights run the MXU at full rate
    # (avoids silent f32 promotion); accumulation is f32 regardless.
    x_mm = x if x.dtype == w1_ref.dtype else x.astype(w1_ref.dtype)
    h = jnp.dot(x_mm, w1_ref[...], preferred_element_type=jnp.float32)
    h = h + b1_ref[...].astype(jnp.float32)
    # Exact erf-GELU matches torch.nn.GELU(); approximate=True uses tanh on the EUP.
    h = jax.nn.gelu(h, approximate=approximate_gelu)
    y = jnp.dot(h.astype(w2_ref.dtype), w2_ref[...],
                preferred_element_type=jnp.float32)
    y = y + b2_ref[...].astype(jnp.float32)
    if skip_connect:
        y = y + x.astype(jnp.float32)
    o_ref[...] = y.astype(o_ref.dtype)


def _adapter_kernel_htiled(x_ref, w1_ref, b1_ref, w2_ref, b2_ref, o_ref, acc_ref, *,
                           skip_connect, approximate_gelu):
    """H-tiled kernel: grid = (row tiles, H tiles); fc2 accumulated in f32 VMEM."""
    j = pl.program_id(1)

    @pl.when(j == 0)
    def _():
        acc_ref[...] = jnp.zeros_like(acc_ref)

    x = x_ref[...]
    x_mm = x if x.dtype == w1_ref.dtype else x.astype(w1_ref.dtype)
    h = jnp.dot(x_mm, w1_ref[...], preferred_element_type=jnp.float32)
    h = h + b1_ref[...].astype(jnp.float32)
    h = jax.nn.gelu(h, approximate=approximate_gelu)
    acc_ref[...] += jnp.dot(h.astype(w2_ref.dtype), w2_ref[...],
                            preferred_element_type=jnp.float32)

    @pl.when(j == pl.num_programs(1) - 1)
    def _():
        y = acc_ref[...] + b2_ref[...].astype(jnp.float32)
        if skip_connect:
            y = y + x.astype(jnp.float32)
        o_ref[...] = y.astype(o_ref.dtype)


# ---------------------------------------------------------------------------
# Wrapper
# ---------------------------------------------------------------------------
def adapter_forward(x, w1, b1, w2, b2, *, skip_connect=True, tile_rows=512,
                    approximate_gelu=False, force_h_tiling=False):
    """Fused Adapter forward: gelu(x @ w1 + b1) @ w2 + b2 (+ x).

    x: (..., D); w1: (D, H); b1: (H,); w2: (H, D); b2: (D,).
    Weights are stored pre-transposed (in, out) relative to torch.nn.Linear.
    Pass bf16 weights/activations for full-rate MXU; accumulation is f32 either way.
    """
    orig_shape = x.shape
    D = orig_shape[-1]
    H = w1.shape[1]
    if w1.shape != (D, H) or w2.shape != (H, D) or b1.shape != (H,) or b2.shape != (D,):
        raise ValueError("parameter shapes inconsistent with x")

    x2 = x.reshape(-1, D)
    N = x2.shape[0]
    x_item = jnp.dtype(x2.dtype).itemsize
    w_item = jnp.dtype(w1.dtype).itemsize
    sublane = _sublane(x2.dtype)

    capacity = _vmem_capacity_bytes()        # per-TensorCore VMEM (v5e/v6e 128 MiB, v7x 64 MiB)
    budget = int(0.80 * capacity)            # working-set budget (compiler headroom)
    vmem_cap = int(0.94 * capacity)          # ceiling for vmem_limit_bytes

    # Lane-dense padding: D and H up to multiples of 128.  Zero-padded weight
    # rows/cols and bias entries contribute exactly 0 (gelu(0) = 0), and padded
    # output columns are sliced off, so numerics are unchanged.
    Dp = _round_up(D, 128)
    Hp = _round_up(H, 128)

    # Single-buffered resident weight bytes, charged per TensorCore (each v7x
    # core holds its own full copy when rows shard across cores).
    weight_bytes_sb = (Dp * Hp + Hp * Dp + Hp + Dp) * w_item
    use_h_tiling = force_h_tiling or weight_bytes_sb > budget // 2

    if use_h_tiling:
        # 2-D grid (rows, H tiles): fc1+GELU+fc2 per H slice, accumulated in an
        # f32 VMEM scratch; b2 / residual / store happen at the last H slice.
        kH = _cdiv(Hp, 128) if force_h_tiling else 1
        while True:
            tH = _round_up(_cdiv(Hp, kH), 128)
            # W1/W2 H-slices are pipelined (double-buffered); b2 is invariant.
            step_w_bytes = (2 * (Dp * tH + tH * Dp + tH) + Dp) * w_item
            if step_w_bytes <= budget // 2 or tH == 128:
                break
            kH += 1
        Hpad = kH * tH                      # pad H so every H block is full
        h_act = tH
        weight_resident = step_w_bytes
        tm = _pick_tile_rows(N, Dp, h_act, x_item, weight_resident, tile_rows,
                             sublane, budget)
        grid = (_cdiv(N, tm), kH)
        dim_sem = ("parallel", "arbitrary")
        kernel_fn = _adapter_kernel_htiled
        scratch = [pltpu.VMEM((tm, Dp), jnp.float32)]

        def make_specs(sb):
            in_specs = [
                pl.BlockSpec((tm, Dp), lambda i, j: (i, 0)),      # x row tile
                pl.BlockSpec((Dp, tH), lambda i, j: (0, j)),      # W1 H-slice
                pl.BlockSpec((1, tH), lambda i, j: (0, j)),       # b1 H-slice
                pl.BlockSpec((tH, Dp), lambda i, j: (j, 0)),      # W2 H-slice
                _const_spec((1, Dp), lambda i, j: (0, 0), sb),    # b2 (grid-invariant)
            ]
            out_specs = pl.BlockSpec((tm, Dp), lambda i, j: (i, 0))
            return in_specs, out_specs
    else:
        Hpad = Hp
        h_act = Hp
        weight_resident = weight_bytes_sb
        tm = _pick_tile_rows(N, Dp, h_act, x_item, weight_resident, tile_rows,
                             sublane, budget)
        grid = (_cdiv(N, tm),)
        dim_sem = ("parallel",)
        kernel_fn = _adapter_kernel
        scratch = []

        def make_specs(sb):
            in_specs = [
                pl.BlockSpec((tm, Dp), lambda i: (i, 0)),         # x row tile
                _const_spec((Dp, Hpad), lambda i: (0, 0), sb),    # W1 (grid-invariant)
                _const_spec((1, Hpad), lambda i: (0, 0), sb),     # b1
                _const_spec((Hpad, Dp), lambda i: (0, 0), sb),    # W2
                _const_spec((1, Dp), lambda i: (0, 0), sb),       # b2
            ]
            out_specs = pl.BlockSpec((tm, Dp), lambda i: (i, 0))
            return in_specs, out_specs

    x_p = _pad_to(x2, (N, Dp))
    w1_p = _pad_to(w1, (Dp, Hpad))
    b1_p = _pad_to(b1.reshape(1, H), (1, Hpad))
    w2_p = _pad_to(w2, (Hpad, Dp))
    b2_p = _pad_to(b2.reshape(1, D), (1, Dp))

    # Scoped-VMEM estimate -> raise the 32 MiB default when needed, capped per generation.
    est = weight_resident + 4 * tm * Dp * x_item + tm * (h_act + 2 * Dp) * 4
    vmem_limit = int(min(vmem_cap, max(32 * 1024 * 1024, int(1.25 * est))))

    cost = pl.CostEstimate(
        flops=4 * N * Dp * Hpad,
        transcendentals=N * Hpad,
        bytes_accessed=2 * N * Dp * x_item + (Dp * Hpad + Hpad * Dp + Hpad + Dp) * w_item,
    )

    def run(single_buffer_weights, approx):
        in_specs, out_specs = make_specs(single_buffer_weights)
        kern = functools.partial(kernel_fn, skip_connect=skip_connect,
                                 approximate_gelu=approx)
        return pl.pallas_call(
            kern,
            out_shape=jax.ShapeDtypeStruct((N, Dp), x.dtype),
            grid_spec=pltpu.PrefetchScalarGridSpec(
                num_scalar_prefetch=0,
                grid=grid,
                in_specs=in_specs,
                out_specs=out_specs,
                scratch_shapes=scratch,
            ),
            compiler_params=pltpu.CompilerParams(
                dimension_semantics=dim_sem,
                vmem_limit_bytes=vmem_limit,
            ),
            cost_estimate=cost,
        )(x_p, w1_p, b1_p, w2_p, b2_p)

    # Preferred configuration first, then progressively more conservative ones so
    # the kernel still runs on jax/libtpu builds lacking Buffered(1) single
    # buffering or an exact-erf lowering.
    # TODO(synk): the tanh-GELU last-resort fallback deviates from torch.nn.GELU()
    # exact erf numerics by <= ~1e-3; drop it once exact erf is guaranteed.
    configs = []
    for cfg in [(True, approximate_gelu), (False, approximate_gelu),
                (True, True), (False, True)]:
        if cfg not in configs:
            configs.append(cfg)
    out, last_err = None, None
    for sb, approx in configs:
        try:
            out = run(sb, approx)
            break
        except Exception as e:  # noqa: BLE001 - retry with a more conservative config
            last_err = e
    if out is None:
        raise last_err

    if Dp != D:
        out = out[:, :D]
    return out.reshape(orig_shape)


# ---------------------------------------------------------------------------
# Params / reference
# ---------------------------------------------------------------------------
def init_adapter_params(key, d_features, mlp_ratio=0.5, dtype=jnp.float32):
    """Deterministic init matching torch.nn.Linear bounds.

    torch Linear weights are (out, in); we store them pre-transposed as (in, out)."""
    d_hidden = int(d_features * mlp_ratio)
    k1, k2, k3, k4 = jax.random.split(key, 4)
    bound1 = 1.0 / (d_features ** 0.5)
    bound2 = 1.0 / (d_hidden ** 0.5)
    w1 = jax.random.uniform(k1, (d_features, d_hidden), dtype, -bound1, bound1)
    b1 = jax.random.uniform(k2, (d_hidden,), dtype, -bound1, bound1)
    w2 = jax.random.uniform(k3, (d_hidden, d_features), dtype, -bound2, bound2)
    b2 = jax.random.uniform(k4, (d_features,), dtype, -bound2, bound2)
    return w1, b1, w2, b2


def adapter_reference(x, w1, b1, w2, b2, skip_connect=True, approximate_gelu=False):
    hp = jax.lax.Precision.HIGHEST
    h = jax.nn.gelu(jnp.dot(x, w1, precision=hp) + b1, approximate=approximate_gelu)
    y = jnp.dot(h, w2, precision=hp) + b2
    return x + y if skip_connect else y


# ---------------------------------------------------------------------------
# Demo / self-test
# ---------------------------------------------------------------------------
if __name__ == "__main__":
    key = jax.random.PRNGKey(0)
    k_x, k_p = jax.random.split(key)

    # Tolerances accommodate MXU default-precision (bf16-pass) differences between
    # the in-kernel dots and the HIGHEST-precision XLA reference.
    TOL = dict(atol=2e-2, rtol=2e-2)

    # --- main path: small adapter (D=32, H=16), f32, skip connection -------------
    batch, seq, d_features = 2, 8, 32
    x = jax.random.normal(k_x, (batch, seq, d_features), jnp.float32)
    w1, b1, w2, b2 = init_adapter_params(k_p, d_features, mlp_ratio=0.5)

    out = jax.block_until_ready(adapter_forward(x, w1, b1, w2, b2, skip_connect=True))
    ref = adapter_reference(x, w1, b1, w2, b2, skip_connect=True)
    assert out.shape == x.shape
    assert jnp.allclose(out, ref, **TOL), "mismatch vs JAX reference (main path)"

    # --- partial last row block (N=15, tile_rows=8), no skip connection ----------
    x_odd = jax.random.normal(k_x, (3, 5, d_features), jnp.float32)
    out_odd = jax.block_until_ready(
        adapter_forward(x_odd, w1, b1, w2, b2, skip_connect=False, tile_rows=8))
    ref_odd = adapter_reference(x_odd, w1, b1, w2, b2, skip_connect=False)
    assert jnp.allclose(out_odd, ref_odd, **TOL), "mismatch (partial row block)"

    # --- forced H-tiled accumulator path (D=512, H=256 -> 2 H tiles of 128) ------
    d_big = 512
    xb = jax.random.normal(k_x, (2, 8, d_big), jnp.float32)
    w1b, b1b, w2b, b2b = init_adapter_params(k_p, d_big, mlp_ratio=0.5)
    out_b = jax.block_until_ready(
        adapter_forward(xb, w1b, b1b, w2b, b2b, skip_connect=True, force_h_tiling=True))
    ref_b = adapter_reference(xb, w1b, b1b, w2b, b2b, skip_connect=True)
    assert jnp.allclose(out_b, ref_b, **TOL), "mismatch (H-tiled accumulator path)"

    # --- bf16 mixed-precision path (+ tanh GELU on the EUP) ----------------------
    to_bf = lambda a: a.astype(jnp.bfloat16)
    out_bf = jax.block_until_ready(
        adapter_forward(to_bf(x), to_bf(w1), to_bf(b1), to_bf(w2), to_bf(b2),
                        skip_connect=True, approximate_gelu=True))
    ref_bf = adapter_reference(to_bf(x).astype(jnp.float32), to_bf(w1).astype(jnp.float32),
                               to_bf(b1).astype(jnp.float32), to_bf(w2).astype(jnp.float32),
                               to_bf(b2).astype(jnp.float32), skip_connect=True,
                               approximate_gelu=True)
    assert jnp.allclose(out_bf.astype(jnp.float32), ref_bf, atol=1e-1, rtol=5e-2), \
        "mismatch (bf16 path)"

    print("KERNEL_OK")
</pallas_src>

<mosaic_0001>
module attributes {stable_mosaic.version = 11 : i64} {
  func.func @_adapter_kernel(%arg0: i32, %arg1: memref<16x128xf32, #tpu.memory_space<vmem>>, %arg2: memref<128x128xf32, #tpu.memory_space<vmem>>, %arg3: memref<1x128xf32, #tpu.memory_space<vmem>>, %arg4: memref<128x128xf32, #tpu.memory_space<vmem>>, %arg5: memref<1x128xf32, #tpu.memory_space<vmem>>, %arg6: memref<16x128xf32, #tpu.memory_space<vmem>>) attributes {dimension_semantics = [#tpu.dimension_semantics<parallel>], iteration_bounds = array<i64: 1>, scalar_prefetch = 0 : i64, scratch_operands = 0 : i64, tpu.core_type = #tpu.core_type<tc>, window_params = [{transform_indices = @transform_0, window_bounds = array<i64: 16, 128>}, {pipeline_mode = #tpu.pipeline_mode<synchronous>, transform_indices = @transform_1, window_bounds = array<i64: 128, 128>}, {pipeline_mode = #tpu.pipeline_mode<synchronous>, transform_indices = @transform_2, window_bounds = array<i64: 1, 128>}, {pipeline_mode = #tpu.pipeline_mode<synchronous>, transform_indices = @transform_3, window_bounds = array<i64: 128, 128>}, {pipeline_mode = #tpu.pipeline_mode<synchronous>, transform_indices = @transform_4, window_bounds = array<i64: 1, 128>}, {transform_indices = @transform_5, window_bounds = array<i64: 16, 128>}]} {
    %c0 = arith.constant 0 : index
    %c0_0 = arith.constant 0 : index
    %0 = vector.load %arg1[%c0, %c0_0] : memref<16x128xf32, #tpu.memory_space<vmem>>, vector<16x128xf32>
    %c0_1 = arith.constant 0 : index
    %c0_2 = arith.constant 0 : index
    %1 = vector.load %arg2[%c0_1, %c0_2] : memref<128x128xf32, #tpu.memory_space<vmem>>, vector<128x128xf32>
    %cst = arith.constant dense<0.000000e+00> : vector<16x128xf32>
    %2 = tpu.matmul %0, %1, %cst {dimension_numbers = #tpu.dot_dimension_numbers<[1], [0], [0], [1], [0, 0, 1, 1], [], []>} : vector<16x128xf32>, vector<128x128xf32>, vector<16x128xf32> -> vector<16x128xf32>
    %c0_3 = arith.constant 0 : index
    %c0_4 = arith.constant 0 : index
    %3 = vector.load %arg3[%c0_3, %c0_4] : memref<1x128xf32, #tpu.memory_space<vmem>>, vector<1x128xf32>
    %4 = vector.broadcast %3 : vector<1x128xf32> to vector<16x128xf32>
    %5 = arith.addf %2, %4 : vector<16x128xf32>
    %6 = arith.mulf %5, %5 : vector<16x128xf32>
    %7 = arith.mulf %5, %6 : vector<16x128xf32>
    %cst_5 = arith.constant 4.471500e-02 : f32
    %8 = vector.broadcast %cst_5 : f32 to vector<16x128xf32>
    %9 = arith.mulf %8, %7 : vector<16x128xf32>
    %10 = arith.addf %5, %9 : vector<16x128xf32>
    %cst_6 = arith.constant 0.797884583 : f32
    %11 = vector.broadcast %cst_6 : f32 to vector<16x128xf32>
    %12 = arith.mulf %11, %10 : vector<16x128xf32>
    %13 = math.tanh %12 : vector<16x128xf32>
    %cst_7 = arith.constant 1.000000e+00 : f32
    %14 = vector.broadcast %cst_7 : f32 to vector<16x128xf32>
    %15 = arith.addf %14, %13 : vector<16x128xf32>
    %cst_8 = arith.constant 5.000000e-01 : f32
    %16 = vector.broadcast %cst_8 : f32 to vector<16x128xf32>
    %17 = arith.mulf %16, %15 : vector<16x128xf32>
    %18 = arith.mulf %5, %17 : vector<16x128xf32>
    %c0_9 = arith.constant 0 : index
    %c0_10 = arith.constant 0 : index
    %19 = vector.load %arg4[%c0_9, %c0_10] : memref<128x128xf32, #tpu.memory_space<vmem>>, vector<128x128xf32>
    %cst_11 = arith.constant dense<0.000000e+00> : vector<16x128xf32>
    %20 = tpu.matmul %18, %19, %cst_11 {dimension_numbers = #tpu.dot_dimension_numbers<[1], [0], [0], [1], [0, 0, 1, 1], [], []>} : vector<16x128xf32>, vector<128x128xf32>, vector<16x128xf32> -> vector<16x128xf32>
    %c0_12 = arith.constant 0 : index
    %c0_13 = arith.constant 0 : index
    %21 = vector.load %arg5[%c0_12, %c0_13] : memref<1x128xf32, #tpu.memory_space<vmem>>, vector<1x128xf32>
    %22 = vector.broadcast %21 : vector<1x128xf32> to vector<16x128xf32>
    %23 = arith.addf %20, %22 : vector<16x128xf32>
    %24 = arith.addf %23, %0 : vector<16x128xf32>
    %c0_14 = arith.constant 0 : index
    %c0_15 = arith.constant 0 : index
    %25 = vector.load %arg6[%c0_14, %c0_15] : memref<16x128xf32, #tpu.memory_space<vmem>>, vector<16x128xf32>
    tpu.vector_store %arg6[%c0_14, %c0_15], %24 {strides = array<i32>} : memref<16x128xf32, #tpu.memory_space<vmem>>, vector<16x128xf32>,
    return
  }
  func.func @transform_0(%arg0: i32) -> (i32, i32) {
    %c0_i32 = arith.constant 0 : i32
    %c0_i32_0 = arith.constant 0 : i32
    return %arg0, %c0_i32 : i32, i32
  }
  func.func @transform_1(%arg0: i32) -> (i32, i32) {
    %c0_i32 = arith.constant 0 : i32
    %c0_i32_0 = arith.constant 0 : i32
    %c0_i32_1 = arith.constant 0 : i32
    return %c0_i32, %c0_i32_0 : i32, i32
  }
  func.func @transform_2(%arg0: i32) -> (i32, i32) {
    %c0_i32 = arith.constant 0 : i32
    %c0_i32_0 = arith.constant 0 : i32
    %c0_i32_1 = arith.constant 0 : i32
    return %c0_i32, %c0_i32_0 : i32, i32
  }
  func.func @transform_3(%arg0: i32) -> (i32, i32) {
    %c0_i32 = arith.constant 0 : i32
    %c0_i32_0 = arith.constant 0 : i32
    %c0_i32_1 = arith.constant 0 : i32
    return %c0_i32, %c0_i32_0 : i32, i32
  }
  func.func @transform_4(%arg0: i32) -> (i32, i32) {
    %c0_i32 = arith.constant 0 : i32
    %c0_i32_0 = arith.constant 0 : i32
    %c0_i32_1 = arith.constant 0 : i32
    return %c0_i32, %c0_i32_0 : i32, i32
  }
  func.func @transform_5(%arg0: i32) -> (i32, i32) {
    %c0_i32 = arith.constant 0 : i32
    %c0_i32_0 = arith.constant 0 : i32
    return %arg0, %c0_i32 : i32, i32
  }
}

module attributes {stable_mosaic.version = 11 : i64} {
  func.func @_adapter_kernel(%arg0: i32, %arg1: memref<16x128xf32, #tpu.memory_space<vmem>>, %arg2: memref<128x128xf32, #tpu.memory_space<vmem>>, %arg3: memref<1x128xf32, #tpu.memory_space<vmem>>, %arg4: memref<128x128xf32, #tpu.memory_space<vmem>>, %arg5: memref<1x128xf32, #tpu.memory_space<vmem>>, %arg6: memref<16x128xf32, #tpu.memory_space<vmem>>) attributes {dimension_semantics = [#tpu.dimension_semantics<parallel>], iteration_bounds = array<i64: 1>, scalar_prefetch = 0 : i64, scratch_operands = 0 : i64, tpu.core_type = #tpu.core_type<tc>, window_params = [{transform_indices = @transform_0, window_bounds = array<i64: 16, 128>}, {pipeline_mode = #tpu.pipeline_mode<synchronous>, transform_indices = @transform_1, window_bounds = array<i64: 128, 128>}, {pipeline_mode = #tpu.pipeline_mode<synchronous>, transform_indices = @transform_2, window_bounds = array<i64: 1, 128>}, {pipeline_mode = #tpu.pipeline_mode<synchronous>, transform_indices = @transform_3, window_bounds = array<i64: 128, 128>}, {pipeline_mode = #tpu.pipeline_mode<synchronous>, transform_indices = @transform_4, window_bounds = array<i64: 1, 128>}, {transform_indices = @transform_5, window_bounds = array<i64: 16, 128>}]} {
    %c0 = arith.constant 0 : index
    %c0_0 = arith.constant 0 : index
    %0 = vector.load %arg1[%c0, %c0_0] : memref<16x128xf32, #tpu.memory_space<vmem>>, vector<16x128xf32>
    %c0_1 = arith.constant 0 : index
    %c0_2 = arith.constant 0 : index
    %1 = vector.load %arg2[%c0_1, %c0_2] : memref<128x128xf32, #tpu.memory_space<vmem>>, vector<128x128xf32>
    %cst = arith.constant dense<0.000000e+00> : vector<16x128xf32>
    %2 = tpu.matmul %0, %1, %cst {dimension_numbers = #tpu.dot_dimension_numbers<[1], [0], [0], [1], [0, 0, 1, 1], [], []>} : vector<16x128xf32>, vector<128x128xf32>, vector<16x128xf32> -> vector<16x128xf32>
    %c0_3 = arith.constant 0 : index
    %c0_4 = arith.constant 0 : index
    %3 = vector.load %arg3[%c0_3, %c0_4] : memref<1x128xf32, #tpu.memory_space<vmem>>, vector<1x128xf32>
    %4 = vector.broadcast %3 : vector<1x128xf32> to vector<16x128xf32>
    %5 = arith.addf %2, %4 : vector<16x128xf32>
    %6 = arith.mulf %5, %5 : vector<16x128xf32>
    %7 = arith.mulf %5, %6 : vector<16x128xf32>
    %cst_5 = arith.constant 4.471500e-02 : f32
    %8 = vector.broadcast %cst_5 : f32 to vector<16x128xf32>
    %9 = arith.mulf %8, %7 : vector<16x128xf32>
    %10 = arith.addf %5, %9 : vector<16x128xf32>
    %cst_6 = arith.constant 0.797884583 : f32
    %11 = vector.broadcast %cst_6 : f32 to vector<16x128xf32>
    %12 = arith.mulf %11, %10 : vector<16x128xf32>
    %13 = math.tanh %12 : vector<16x128xf32>
    %cst_7 = arith.constant 1.000000e+00 : f32
    %14 = vector.broadcast %cst_7 : f32 to vector<16x128xf32>
    %15 = arith.addf %14, %13 : vector<16x128xf32>
    %cst_8 = arith.constant 5.000000e-01 : f32
    %16 = vector.broadcast %cst_8 : f32 to vector<16x128xf32>
    %17 = arith.mulf %16, %15 : vector<16x128xf32>
    %18 = arith.mulf %5, %17 : vector<16x128xf32>
    %c0_9 = arith.constant 0 : index
    %c0_10 = arith.constant 0 : index
    %19 = vector.load %arg4[%c0_9, %c0_10] : memref<128x128xf32, #tpu.memory_space<vmem>>, vector<128x128xf32>
    %cst_11 = arith.constant dense<0.000000e+00> : vector<16x128xf32>
    %20 = tpu.matmul %18, %19, %cst_11 {dimension_numbers = #tpu.dot_dimension_numbers<[1], [0], [0], [1], [0, 0, 1, 1], [], []>} : vector<16x128xf32>, vector<128x128xf32>, vector<16x128xf32> -> vector<16x128xf32>
    %c0_12 = arith.constant 0 : index
    %c0_13 = arith.constant 0 : index
    %21 = vector.load %arg5[%c0_12, %c0_13] : memref<1x128xf32, #tpu.memory_space<vmem>>, vector<1x128xf32>
    %22 = vector.broadcast %21 : vector<1x128xf32> to vector<16x128xf32>
    %23 = arith.addf %20, %22 : vector<16x128xf32>
    %24 = arith.addf %23, %0 : vector<16x128xf32>
    %c0_14 = arith.constant 0 : index
    %c0_15 = arith.constant 0 : index
    %25 = vector.load %arg6[%c0_14, %c0_15] : memref<16x128xf32, #tpu.memory_space<vmem>>, vector<16x128xf32>
    tpu.vector_store %arg6[%c0_14, %c0_15], %24 {strides = array<i32>} : memref<16x128xf32, #tpu.memory_space<vmem>>, vector<16x128xf32>,
    return
  }
  func.func @transform_0(%arg0: i32) -> (i32, i32) {
    %c0_i32 = arith.constant 0 : i32
    %c0_i32_0 = arith.constant 0 : i32
    return %arg0, %c0_i32 : i32, i32
  }
  func.func @transform_1(%arg0: i32) -> (i32, i32) {
    %c0_i32 = arith.constant 0 : i32
    %c0_i32_0 = arith.constant 0 : i32
    %c0_i32_1 = arith.constant 0 : i32
    return %c0_i32, %c0_i32_0 : i32, i32
  }
  func.func @transform_2(%arg0: i32) -> (i32, i32) {
    %c0_i32 = arith.constant 0 : i32
    %c0_i32_0 = arith.constant 0 : i32
    %c0_i32_1 = arith.constant 0 : i32
    return %c0_i32, %c0_i32_0 : i32, i32
  }
  func.func @transform_3(%arg0: i32) -> (i32, i32) {
    %c0_i32 = arith.constant 0 : i32
    %c0_i32_0 = arith.constant 0 : i32
    %c0_i32_1 = arith.constant 0 : i32
    return %c0_i32, %c0_i32_0 : i32, i32
  }
  func.func @transform_4(%arg0: i32) -> (i32, i32) {
    %c0_i32 = arith.constant 0 : i32
    %c0_i32_0 = arith.constant 0 : i32
    %c0_i32_1 = arith.constant 0 : i32
    return %c0_i32, %c0_i32_0 : i32, i32
  }
  func.func @transform_5(%arg0: i32) -> (i32, i32) {
    %c0_i32 = arith.constant 0 : i32
    %c0_i32_0 = arith.constant 0 : i32
    return %arg0, %c0_i32 : i32, i32
  }
}

</mosaic_0001>

<bundles_post_ra>
// kernel: tpu_custom_call.1
= control target key start
LH: loop header
LB: loop body
LE: loop exit
PB: predicated region body
PF: predicated region fallthrough
CT: control target
= control target key end

     0   :  { %10 = vsyncpa [#allocation3], 0  ;;  %s418_s0 = inlined_call_operand.hbm [shape: f32[16,128], index: 0, kind: input, shape index: {}]   ;;  %s419_s1 = inlined_call_operand.hbm [shape: f32[128,128], index: 1, kind: input, shape index: {}]   ;;  %s420_s2 = inlined_call_operand.vmem [shape: f32[1,128], index: 2, kind: input, shape index: {}]   ;;  %s421_s3 = inlined_call_operand.hbm [shape: f32[128,128], index: 3, kind: input, shape index: {}]   ;;  %s422_s4 = inlined_call_operand.vmem [shape: f32[1,128], index: 4, kind: input, shape index: {}]   ;;  %s423_s5 = inlined_call_operand.hbm [shape: f32[16,128], index: 5, kind: output, shape index: {}]  }
   0x1   :  { %11 = vsyncpa [#allocation6], 0 }
   0x2   :  { %12 = vsyncpa [#allocation4], 0  ;;  %s30_s20 = sshll.u32 %s419_s1, 4  ;;  %s344_s21 = smov [#allocation5]   ;;  %s31_s20 = int_to_ptr.hbm [resolvable:$true] %s30_s20 }
   0x3   :  { %s32_s22 = sshll.u32 %s344_s21, 4  ;;  %s17_s25 = sshll.u32 %s418_s0, 4  ;;  %s33_s22 = int_to_ptr.vmem [resolvable:$true] %s32_s22  ;;  %s18_s25 = int_to_ptr.hbm [resolvable:$true] %s17_s25 }
   0x4   :  { %s345_s26 = smov 128   ;;  %s346_s27 = smov 8  }
   0x5   :  { %38 = dma.hbm_to_vmem [thread:$0]  %s31_s20, 2048, %s33_s22, [#allocation6], %s345_s26, %s345_s26, %s346_s27  }
   0x6   :  { %s347_s28 = smov [#allocation2]   ;;  %s45_s1 = sshll.u32 %s421_s3, 4  ;;  %s46_s1 = int_to_ptr.hbm [resolvable:$true] %s45_s1 }
   0x7   :  { %s19_s29 = sshll.u32 %s347_s28, 4  ;;  %s348_s0 = smov [#allocation7]   ;;  %s20_s29 = int_to_ptr.vmem [resolvable:$true] %s19_s29 }
   0x8   :  { %25 = dma.hbm_to_vmem [thread:$0]  %s18_s25, 256, %s20_s29, [#allocation3], %s345_s26, %s345_s26, %s346_s27  }
   0x9   :  { %s47_s7 = sshll.u32 %s348_s0, 4  ;;  %s48_s7 = int_to_ptr.vmem [resolvable:$true] %s47_s7 }
   0xa   :  { %53 = dma.hbm_to_vmem [thread:$0]  %s46_s1, 2048, %s48_s7, [#allocation6], %s345_s26, %s345_s26, %s346_s27  }
   0xb   :  { %338 = dma.done.wait [#allocation3], 256  }
   0xc   :  { %339 = vsyncadd [#allocation3], 4294967040 }
   0xd   :  { %340 = dma.done.wait [#allocation6], 4096  }
   0xe   :  { %341 = vsyncadd [#allocation6], 4294963200  ;;  %v85_v0 = vld [vmem:[#allocation5 + $0x78] sm:$0xff]  ;;  %v84_v1 = vld [vmem:[#allocation5 + $0x70] sm:$0xff]  ;;  %s349_s10 = smov [#allocation8]   ;;  %s184_s14 = sshll.u32 %s423_s5, 4  ;;  %s185_s14 = int_to_ptr.hbm [resolvable:$true] %s184_s14 }
   0xf   :  { %90 = vmatpush.msra.mxu0 %v85_v0  ;;  %198 = vmatpush.msra.mxu2 %v85_v0  ;;  %v83_v2 = vld [vmem:[#allocation5 + $0x68] sm:$0xff]  ;;  %v82_v3 = vld [vmem:[#allocation5 + $0x60] sm:$0xff]  ;;  %v81_v4 = vld [vmem:[#allocation5 + $0x58] sm:$0xff]  ;;  %s182_s11 = sshll.u32 %s349_s10, 4  ;;  %s183_s11 = int_to_ptr.vmem [resolvable:$true] %s182_s11 }
  0x10   :  { %v146_v5 = vld [vmem:[#allocation7 + $0x78] sm:$0xff]  ;;  %v145_v6 = vld [vmem:[#allocation7 + $0x70] sm:$0xff]  ;;  %v144_v8 = vld [vmem:[#allocation7 + $0x68] sm:$0xff] }
  0x11   :  { %91 = vmatpush.msra.mxu0 %v84_v1  ;;  %199 = vmatpush.msra.mxu2 %v84_v1  ;;  %v80_v7 = vld [vmem:[#allocation5 + $0x50] sm:$0xff]  ;;  %v79_v9 = vld [vmem:[#allocation5 + $0x48] sm:$0xff]  ;;  %v78_v10 = vld [vmem:[#allocation5 + $0x40] sm:$0xff] }
  0x12   :  { %151 = vmatpush.msra.mxu1 %v146_v5  ;;  %214 = vmatpush.msra.mxu3 %v146_v5  ;;  %v77_v11 = vld [vmem:[#allocation5 + $0x38] sm:$0xff]  ;;  %v76_v12 = vld [vmem:[#allocation5 + $0x30] sm:$0xff]  ;;  %v75_v13 = vld [vmem:[#allocation5 + $0x28] sm:$0xff] }
  0x13   :  { %92 = vmatpush.msra.mxu0 %v83_v2  ;;  %200 = vmatpush.msra.mxu2 %v83_v2  ;;  %v74_v14 = vld [vmem:[#allocation5 + $0x20] sm:$0xff]  ;;  %v73_v15 = vld [vmem:[#allocation5 + $0x18] sm:$0xff]  ;;  %v72_v16 = vld [vmem:[#allocation5 + $0x10] sm:$0xff] }
  0x14   :  { %152 = vmatpush.msra.mxu1 %v145_v6  ;;  %215 = vmatpush.msra.mxu3 %v145_v6  ;;  %v71_v17 = vld [vmem:[#allocation5 + $0x8] sm:$0xff]  ;;  %v70_v18 = vld [vmem:[#allocation5] sm:$0xff]  ;;  %v398_v19 = vld [vmem:[#allocation2] sm:$0xff] }
  0x15   :  { %93 = vmatpush.msra.mxu0 %v82_v3  ;;  %201 = vmatpush.msra.mxu2 %v82_v3  ;;  %v400_v20 = vld [vmem:[#allocation2 + $0x8] sm:$0xff]  ;;  %v143_v21 = vld [vmem:[#allocation7 + $0x60] sm:$0xff]  ;;  %v141_v23 = vld [vmem:[#allocation7 + $0x50] sm:$0xff] }
  0x16   :  { %153 = vmatpush.msra.mxu1 %v144_v8  ;;  %216 = vmatpush.msra.mxu3 %v144_v8  ;;  %v142_v22 = vld [vmem:[#allocation7 + $0x58] sm:$0xff]  ;;  %v140_v24 = vld [vmem:[#allocation7 + $0x48] sm:$0xff]  ;;  %v139_v25 = vld [vmem:[#allocation7 + $0x40] sm:$0xff] }
  0x17   :  { %94 = vmatpush.msra.mxu0 %v81_v4  ;;  %202 = vmatpush.msra.mxu2 %v81_v4  ;;  %v138_v26 = vld [vmem:[#allocation7 + $0x38] sm:$0xff]  ;;  %v137_v27 = vld [vmem:[#allocation7 + $0x30] sm:$0xff]  ;;  %v136_v28 = vld [vmem:[#allocation7 + $0x28] sm:$0xff] }
  0x18   :  { %154 = vmatpush.msra.mxu1 %v143_v21  ;;  %217 = vmatpush.msra.mxu3 %v143_v21  ;;  %v135_v29 = vld [vmem:[#allocation7 + $0x20] sm:$0xff]  ;;  %v134_v30 = vld [vmem:[#allocation7 + $0x18] sm:$0xff]  ;;  %v133_v31 = vld [vmem:[#allocation7 + $0x10] sm:$0xff] }
  0x19   :  { %95 = vmatpush.msra.mxu0 %v80_v7  ;;  %203 = vmatpush.msra.mxu2 %v80_v7  ;;  %v132_v32 = vld [vmem:[#allocation7 + $0x8] sm:$0xff]  ;;  %v131_v33 = vld [vmem:[#allocation7] sm:$0xff]  ;;  %v236_v34 = vld [vmem:[%s420_s2] ss:$0 sm:$0xff] }
  0x1a   :  { %155 = vmatpush.msra.mxu1 %v142_v22  ;;  %218 = vmatpush.msra.mxu3 %v142_v22  ;;  %v237_v57 = vld [vmem:[%s422_s4] ss:$0 sm:$0xff] }
  0x1b   :  { %96 = vmatpush.msra.mxu0 %v79_v9  ;;  %204 = vmatpush.msra.mxu2 %v79_v9 }
  0x1c   :  { %156 = vmatpush.msra.mxu1 %v141_v23  ;;  %219 = vmatpush.msra.mxu3 %v141_v23 }
  0x1d   :  { %97 = vmatpush.msra.mxu0 %v78_v10  ;;  %205 = vmatpush.msra.mxu2 %v78_v10 }
  0x1e   :  { %157 = vmatpush.msra.mxu1 %v140_v24  ;;  %220 = vmatpush.msra.mxu3 %v140_v24 }
  0x1f   :  { %98 = vmatpush.msra.mxu0 %v77_v11  ;;  %206 = vmatpush.msra.mxu2 %v77_v11 }
  0x20   :  { %158 = vmatpush.msra.mxu1 %v139_v25  ;;  %221 = vmatpush.msra.mxu3 %v139_v25 }
  0x21   :  { %99 = vmatpush.msra.mxu0 %v76_v12  ;;  %207 = vmatpush.msra.mxu2 %v76_v12 }
  0x22   :  { %159 = vmatpush.msra.mxu1 %v138_v26  ;;  %222 = vmatpush.msra.mxu3 %v138_v26 }
  0x23   :  { %100 = vmatpush.msra.mxu0 %v75_v13  ;;  %208 = vmatpush.msra.mxu2 %v75_v13 }
  0x24   :  { %160 = vmatpush.msra.mxu1 %v137_v27  ;;  %223 = vmatpush.msra.mxu3 %v137_v27 }
  0x25   :  { %101 = vmatpush.msra.mxu0 %v74_v14  ;;  %209 = vmatpush.msra.mxu2 %v74_v14 }
  0x26   :  { %161 = vmatpush.msra.mxu1 %v136_v28  ;;  %224 = vmatpush.msra.mxu3 %v136_v28 }
  0x27   :  { %102 = vmatpush.msra.mxu0 %v73_v15  ;;  %210 = vmatpush.msra.mxu2 %v73_v15 }
  0x28   :  { %162 = vmatpush.msra.mxu1 %v135_v29  ;;  %225 = vmatpush.msra.mxu3 %v135_v29 }
  0x29   :  { %103 = vmatpush.msra.mxu0 %v72_v16  ;;  %211 = vmatpush.msra.mxu2 %v72_v16 }
  0x2a   :  { %163 = vmatpush.msra.mxu1 %v134_v30  ;;  %226 = vmatpush.msra.mxu3 %v134_v30 }
  0x2b   :  { %104 = vmatpush.msra.mxu0 %v71_v17  ;;  %212 = vmatpush.msra.mxu2 %v71_v17 }
  0x2c   :  { %164 = vmatpush.msra.mxu1 %v133_v31  ;;  %227 = vmatpush.msra.mxu3 %v133_v31 }
  0x2d   :  { %105 = vmatpush.msra.mxu0 %v70_v18  ;;  %213 = vmatpush.msra.mxu2 %v70_v18 }
  0x2e   :  { %106 = vmatmul.f32.vlgmr.msra.gmra.mxu0 %v398_v19  ;;  %109 = vmatmul.f32.vlgmr.msra.gmra.mxu2 %v400_v20 }
  0x2f   :  { %165 = vmatpush.msra.mxu1 %v132_v32  ;;  %228 = vmatpush.msra.mxu3 %v132_v32 }
  0x31   :  { %166 = vmatpush.msra.mxu1 %v131_v33  ;;  %229 = vmatpush.msra.mxu3 %v131_v33 }
  0xab   :  { %v107_v35 = vpop.f32.mrf.mxu0 }
  0xac   :  { %v108_v36 = vadd.f32 %v236_v34, %v107_v35 }
  0xae   :  { %v113_v37 = vmul.f32 %v108_v36, %v108_v36 }
  0xb0   :  { %v115_v38 = vmul.f32 %v113_v37, %v108_v36 }
  0xb1   :  { %v110_v39 = vpop.f32.mrf.mxu2 }
  0xb2   :  { %v111_v40 = vadd.f32 %v236_v34, %v110_v39  ;;  %v117_v41 = vmul.f32 0.044715, %v115_v38 }
  0xb4   :  { %v114_v42 = vmul.f32 %v111_v40, %v111_v40  ;;  %v119_v43 = vadd.f32 %v117_v41, %v108_v36 }
  0xb6   :  { %v116_v44 = vmul.f32 %v114_v42, %v111_v40  ;;  %v121_v45 = vmul.f32 0.7978846, %v119_v43 }
  0xb8   :  { %238 = vtanh.f32 %v121_v45  ;;  %v118_v46 = vmul.f32 0.044715, %v116_v44 }
  0xba   :  { %v120_v47 = vadd.f32 %v118_v46, %v111_v40 }
  0xbc   :  { %v122_v48 = vmul.f32 0.7978846, %v120_v47 }
  0xbe   :  { %v239_v49 = vpop.eup %238  ;;  %240 = vtanh.f32 %v122_v48 }
  0xbf   :  { %v125_v50 = vadd.f32 1.0, %v239_v49 }
  0xc1   :  { %v127_v51 = vmul.f32 0.5, %v125_v50 }
  0xc3   :  { %v129_v52 = vmul.f32 %v127_v51, %v108_v36 }
  0xc4   :  { %v241_v53 = vpop.eup %240 }
  0xc5   :  { %167 = vmatmul.f32.vlgmr.msra.gmra.mxu1 %v129_v52  ;;  %v126_v54 = vadd.f32 1.0, %v241_v53 }
  0xc7   :  { %v128_v55 = vmul.f32 0.5, %v126_v54 }
  0xc9   :  { %v130_v56 = vmul.f32 %v128_v55, %v111_v40 }
  0xcb   :  { %170 = vmatmul.f32.vlgmr.msra.gmra.mxu3 %v130_v56 }
 0x142   :  { %v168_v58 = vpop.f32.mrf.mxu1 }
 0x143   :  { %v169_v59 = vadd.f32 %v237_v57, %v168_v58 }
 0x145   :  { %v174_v60 = vadd.f32 %v169_v59, %v398_v19 }
 0x147   :  { %176 = vst [vmem:[#allocation8] sm:$0xff] %v174_v60 }
 0x14e   :  { %v171_v61 = vpop.f32.mrf.mxu3 }
 0x14f   :  { %v172_v62 = vadd.f32 %v237_v57, %v171_v61 }
 0x151   :  { %v175_v63 = vadd.f32 %v172_v62, %v400_v20 }
 0x153   :  { %177 = vst [vmem:[#allocation8 + $0x8] sm:$0xff] %v175_v63 }
 0x154   :  { %190 = dma.vmem_to_hbm [thread:$0]  %s183_s11, 256, %s185_s14, [#allocation4], %s345_s26, %s345_s26, %s346_s27  }
 0x155   :  { %342 = dma.done.wait [#allocation4], 256  }
 0x156   :  { %343 = vsyncadd [#allocation4], 4294967040 }
 0x157   :  { %195 = vsyncpa [#allocation3], 1 }
 0x158   :  { %196 = vsyncpa [#allocation6], 1 }
 0x159   :  { %197 = vsyncpa [#allocation4], 1 }

// kernel: tpu_custom_call.1
= control target key start
LH: loop header
LB: loop body
LE: loop exit
PB: predicated region body
PF: predicated region fallthrough
CT: control target
= control target key end

     0   :  { %10 = vsyncpa [#allocation3], 0  ;;  %s418_s0 = inlined_call_operand.hbm [shape: f32[16,128], index: 0, kind: input, shape index: {}]   ;;  %s419_s1 = inlined_call_operand.hbm [shape: f32[128,128], index: 1, kind: input, shape index: {}]   ;;  %s420_s2 = inlined_call_operand.vmem [shape: f32[1,128], index: 2, kind: input, shape index: {}]   ;;  %s421_s3 = inlined_call_operand.hbm [shape: f32[128,128], index: 3, kind: input, shape index: {}]   ;;  %s422_s4 = inlined_call_operand.vmem [shape: f32[1,128], index: 4, kind: input, shape index: {}]   ;;  %s423_s5 = inlined_call_operand.hbm [shape: f32[16,128], index: 5, kind: output, shape index: {}]  }
   0x1   :  { %11 = vsyncpa [#allocation6], 0 }
   0x2   :  { %12 = vsyncpa [#allocation4], 0  ;;  %s30_s20 = sshll.u32 %s419_s1, 4  ;;  %s344_s21 = smov [#allocation5]   ;;  %s31_s20 = int_to_ptr.hbm [resolvable:$true] %s30_s20 }
   0x3   :  { %s32_s22 = sshll.u32 %s344_s21, 4  ;;  %s17_s25 = sshll.u32 %s418_s0, 4  ;;  %s33_s22 = int_to_ptr.vmem [resolvable:$true] %s32_s22  ;;  %s18_s25 = int_to_ptr.hbm [resolvable:$true] %s17_s25 }
   0x4   :  { %s345_s26 = smov 128   ;;  %s346_s27 = smov 8  }
   0x5   :  { %38 = dma.hbm_to_vmem [thread:$0]  %s31_s20, 2048, %s33_s22, [#allocation6], %s345_s26, %s345_s26, %s346_s27  }
   0x6   :  { %s347_s28 = smov [#allocation2]   ;;  %s45_s1 = sshll.u32 %s421_s3, 4  ;;  %s46_s1 = int_to_ptr.hbm [resolvable:$true] %s45_s1 }
   0x7   :  { %s19_s29 = sshll.u32 %s347_s28, 4  ;;  %s348_s0 = smov [#allocation7]   ;;  %s20_s29 = int_to_ptr.vmem [resolvable:$true] %s19_s29 }
   0x8   :  { %25 = dma.hbm_to_vmem [thread:$0]  %s18_s25, 256, %s20_s29, [#allocation3], %s345_s26, %s345_s26, %s346_s27  }
   0x9   :  { %s47_s7 = sshll.u32 %s348_s0, 4  ;;  %s48_s7 = int_to_ptr.vmem [resolvable:$true] %s47_s7 }
   0xa   :  { %53 = dma.hbm_to_vmem [thread:$0]  %s46_s1, 2048, %s48_s7, [#allocation6], %s345_s26, %s345_s26, %s346_s27  }
   0xb   :  { %338 = dma.done.wait [#allocation3], 256  }
   0xc   :  { %339 = vsyncadd [#allocation3], 4294967040 }
   0xd   :  { %340 = dma.done.wait [#allocation6], 4096  }
   0xe   :  { %341 = vsyncadd [#allocation6], 4294963200  ;;  %v85_v0 = vld [vmem:[#allocation5 + $0x78] sm:$0xff]  ;;  %v84_v1 = vld [vmem:[#allocation5 + $0x70] sm:$0xff]  ;;  %s349_s10 = smov [#allocation8]   ;;  %s184_s14 = sshll.u32 %s423_s5, 4  ;;  %s185_s14 = int_to_ptr.hbm [resolvable:$true] %s184_s14 }
   0xf   :  { %90 = vmatpush.msra.mxu0 %v85_v0  ;;  %198 = vmatpush.msra.mxu2 %v85_v0  ;;  %v83_v2 = vld [vmem:[#allocation5 + $0x68] sm:$0xff]  ;;  %v82_v3 = vld [vmem:[#allocation5 + $0x60] sm:$0xff]  ;;  %v81_v4 = vld [vmem:[#allocation5 + $0x58] sm:$0xff]  ;;  %s182_s11 = sshll.u32 %s349_s10, 4  ;;  %s183_s11 = int_to_ptr.vmem [resolvable:$true] %s182_s11 }
  0x10   :  { %v146_v5 = vld [vmem:[#allocation7 + $0x78] sm:$0xff]  ;;  %v145_v6 = vld [vmem:[#allocation7 + $0x70] sm:$0xff]  ;;  %v144_v8 = vld [vmem:[#allocation7 + $0x68] sm:$0xff] }
  0x11   :  { %91 = vmatpush.msra.mxu0 %v84_v1  ;;  %199 = vmatpush.msra.mxu2 %v84_v1  ;;  %v80_v7 = vld [vmem:[#allocation5 + $0x50] sm:$0xff]  ;;  %v79_v9 = vld [vmem:[#allocation5 + $0x48] sm:$0xff]  ;;  %v78_v10 = vld [vmem:[#allocation5 + $0x40] sm:$0xff] }
  0x12   :  { %151 = vmatpush.msra.mxu1 %v146_v5  ;;  %214 = vmatpush.msra.mxu3 %v146_v5  ;;  %v77_v11 = vld [vmem:[#allocation5 + $0x38] sm:$0xff]  ;;  %v76_v12 = vld [vmem:[#allocation5 + $0x30] sm:$0xff]  ;;  %v75_v13 = vld [vmem:[#allocation5 + $0x28] sm:$0xff] }
  0x13   :  { %92 = vmatpush.msra.mxu0 %v83_v2  ;;  %200 = vmatpush.msra.mxu2 %v83_v2  ;;  %v74_v14 = vld [vmem:[#allocation5 + $0x20] sm:$0xff]  ;;  %v73_v15 = vld [vmem:[#allocation5 + $0x18] sm:$0xff]  ;;  %v72_v16 = vld [vmem:[#allocation5 + $0x10] sm:$0xff] }
  0x14   :  { %152 = vmatpush.msra.mxu1 %v145_v6  ;;  %215 = vmatpush.msra.mxu3 %v145_v6  ;;  %v71_v17 = vld [vmem:[#allocation5 + $0x8] sm:$0xff]  ;;  %v70_v18 = vld [vmem:[#allocation5] sm:$0xff]  ;;  %v398_v19 = vld [vmem:[#allocation2] sm:$0xff] }
  0x15   :  { %93 = vmatpush.msra.mxu0 %v82_v3  ;;  %201 = vmatpush.msra.mxu2 %v82_v3  ;;  %v400_v20 = vld [vmem:[#allocation2 + $0x8] sm:$0xff]  ;;  %v143_v21 = vld [vmem:[#allocation7 + $0x60] sm:$0xff]  ;;  %v141_v23 = vld [vmem:[#allocation7 + $0x50] sm:$0xff] }
  0x16   :  { %153 = vmatpush.msra.mxu1 %v144_v8  ;;  %216 = vmatpush.msra.mxu3 %v144_v8  ;;  %v142_v22 = vld [vmem:[#allocation7 + $0x58] sm:$0xff]  ;;  %v140_v24 = vld [vmem:[#allocation7 + $0x48] sm:$0xff]  ;;  %v139_v25 = vld [vmem:[#allocation7 + $0x40] sm:$0xff] }
  0x17   :  { %94 = vmatpush.msra.mxu0 %v81_v4  ;;  %202 = vmatpush.msra.mxu2 %v81_v4  ;;  %v138_v26 = vld [vmem:[#allocation7 + $0x38] sm:$0xff]  ;;  %v137_v27 = vld [vmem:[#allocation7 + $0x30] sm:$0xff]  ;;  %v136_v28 = vld [vmem:[#allocation7 + $0x28] sm:$0xff] }
  0x18   :  { %154 = vmatpush.msra.mxu1 %v143_v21  ;;  %217 = vmatpush.msra.mxu3 %v143_v21  ;;  %v135_v29 = vld [vmem:[#allocation7 + $0x20] sm:$0xff]  ;;  %v134_v30 = vld [vmem:[#allocation7 + $0x18] sm:$0xff]  ;;  %v133_v31 = vld [vmem:[#allocation7 + $0x10] sm:$0xff] }
  0x19   :  { %95 = vmatpush.msra.mxu0 %v80_v7  ;;  %203 = vmatpush.msra.mxu2 %v80_v7  ;;  %v132_v32 = vld [vmem:[#allocation7 + $0x8] sm:$0xff]  ;;  %v131_v33 = vld [vmem:[#allocation7] sm:$0xff]  ;;  %v236_v34 = vld [vmem:[%s420_s2] ss:$0 sm:$0xff] }
  0x1a   :  { %155 = vmatpush.msra.mxu1 %v142_v22  ;;  %218 = vmatpush.msra.mxu3 %v142_v22  ;;  %v237_v57 = vld [vmem:[%s422_s4] ss:$0 sm:$0xff] }
  0x1b   :  { %96 = vmatpush.msra.mxu0 %v79_v9  ;;  %204 = vmatpush.msra.mxu2 %v79_v9 }
  0x1c   :  { %156 = vmatpush.msra.mxu1 %v141_v23  ;;  %219 = vmatpush.msra.mxu3 %v141_v23 }
  0x1d   :  { %97 = vmatpush.msra.mxu0 %v78_v10  ;;  %205 = vmatpush.msra.mxu2 %v78_v10 }
  0x1e   :  { %157 = vmatpush.msra.mxu1 %v140_v24  ;;  %220 = vmatpush.msra.mxu3 %v140_v24 }
  0x1f   :  { %98 = vmatpush.msra.mxu0 %v77_v11  ;;  %206 = vmatpush.msra.mxu2 %v77_v11 }
  0x20   :  { %158 = vmatpush.msra.mxu1 %v139_v25  ;;  %221 = vmatpush.msra.mxu3 %v139_v25 }
  0x21   :  { %99 = vmatpush.msra.mxu0 %v76_v12  ;;  %207 = vmatpush.msra.mxu2 %v76_v12 }
  0x22   :  { %159 = vmatpush.msra.mxu1 %v138_v26  ;;  %222 = vmatpush.msra.mxu3 %v138_v26 }
  0x23   :  { %100 = vmatpush.msra.mxu0 %v75_v13  ;;  %208 = vmatpush.msra.mxu2 %v75_v13 }
  0x24   :  { %160 = vmatpush.msra.mxu1 %v137_v27  ;;  %223 = vmatpush.msra.mxu3 %v137_v27 }
  0x25   :  { %101 = vmatpush.msra.mxu0 %v74_v14  ;;  %209 = vmatpush.msra.mxu2 %v74_v14 }
  0x26   :  { %161 = vmatpush.msra.mxu1 %v136_v28  ;;  %224 = vmatpush.msra.mxu3 %v136_v28 }
  0x27   :  { %102 = vmatpush.msra.mxu0 %v73_v15  ;;  %210 = vmatpush.msra.mxu2 %v73_v15 }
  0x28   :  { %162 = vmatpush.msra.mxu1 %v135_v29  ;;  %225 = vmatpush.msra.mxu3 %v135_v29 }
  0x29   :  { %103 = vmatpush.msra.mxu0 %v72_v16  ;;  %211 = vmatpush.msra.mxu2 %v72_v16 }
  0x2a   :  { %163 = vmatpush.msra.mxu1 %v134_v30  ;;  %226 = vmatpush.msra.mxu3 %v134_v30 }
  0x2b   :  { %104 = vmatpush.msra.mxu0 %v71_v17  ;;  %212 = vmatpush.msra.mxu2 %v71_v17 }
  0x2c   :  { %164 = vmatpush.msra.mxu1 %v133_v31  ;;  %227 = vmatpush.msra.mxu3 %v133_v31 }
  0x2d   :  { %105 = vmatpush.msra.mxu0 %v70_v18  ;;  %213 = vmatpush.msra.mxu2 %v70_v18 }
  0x2e   :  { %106 = vmatmul.f32.vlgmr.msra.gmra.mxu0 %v398_v19  ;;  %109 = vmatmul.f32.vlgmr.msra.gmra.mxu2 %v400_v20 }
  0x2f   :  { %165 = vmatpush.msra.mxu1 %v132_v32  ;;  %228 = vmatpush.msra.mxu3 %v132_v32 }
  0x31   :  { %166 = vmatpush.msra.mxu1 %v131_v33  ;;  %229 = vmatpush.msra.mxu3 %v131_v33 }
  0xab   :  { %v107_v35 = vpop.f32.mrf.mxu0 }
  0xac   :  { %v108_v36 = vadd.f32 %v236_v34, %v107_v35 }
  0xae   :  { %v113_v37 = vmul.f32 %v108_v36, %v108_v36 }
  0xb0   :  { %v115_v38 = vmul.f32 %v113_v37, %v108_v36 }
  0xb1   :  { %v110_v39 = vpop.f32.mrf.mxu2 }
  0xb2   :  { %v111_v40 = vadd.f32 %v236_v34, %v110_v39  ;;  %v117_v41 = vmul.f32 0.044715, %v115_v38 }
  0xb4   :  { %v114_v42 = vmul.f32 %v111_v40, %v111_v40  ;;  %v119_v43 = vadd.f32 %v117_v41, %v108_v36 }
  0xb6   :  { %v116_v44 = vmul.f32 %v114_v42, %v111_v40  ;;  %v121_v45 = vmul.f32 0.7978846, %v119_v43 }
  0xb8   :  { %238 = vtanh.f32 %v121_v45  ;;  %v118_v46 = vmul.f32 0.044715, %v116_v44 }
  0xba   :  { %v120_v47 = vadd.f32 %v118_v46, %v111_v40 }
  0xbc   :  { %v122_v48 = vmul.f32 0.7978846, %v120_v47 }
  0xbe   :  { %v239_v49 = vpop.eup %238  ;;  %240 = vtanh.f32 %v122_v48 }
  0xbf   :  { %v125_v50 = vadd.f32 1.0, %v239_v49 }
  0xc1   :  { %v127_v51 = vmul.f32 0.5, %v125_v50 }
  0xc3   :  { %v129_v52 = vmul.f32 %v127_v51, %v108_v36 }
  0xc4   :  { %v241_v53 = vpop.eup %240 }
  0xc5   :  { %167 = vmatmul.f32.vlgmr.msra.gmra.mxu1 %v129_v52  ;;  %v126_v54 = vadd.f32 1.0, %v241_v53 }
  0xc7   :  { %v128_v55 = vmul.f32 0.5, %v126_v54 }
  0xc9   :  { %v130_v56 = vmul.f32 %v128_v55, %v111_v40 }
  0xcb   :  { %170 = vmatmul.f32.vlgmr.msra.gmra.mxu3 %v130_v56 }
 0x142   :  { %v168_v58 = vpop.f32.mrf.mxu1 }
 0x143   :  { %v169_v59 = vadd.f32 %v237_v57, %v168_v58 }
 0x145   :  { %v174_v60 = vadd.f32 %v169_v59, %v398_v19 }
 0x147   :  { %176 = vst [vmem:[#allocation8] sm:$0xff] %v174_v60 }
 0x14e   :  { %v171_v61 = vpop.f32.mrf.mxu3 }
 0x14f   :  { %v172_v62 = vadd.f32 %v237_v57, %v171_v61 }
 0x151   :  { %v175_v63 = vadd.f32 %v172_v62, %v400_v20 }
 0x153   :  { %177 = vst [vmem:[#allocation8 + $0x8] sm:$0xff] %v175_v63 }
 0x154   :  { %190 = dma.vmem_to_hbm [thread:$0]  %s183_s11, 256, %s185_s14, [#allocation4], %s345_s26, %s345_s26, %s346_s27  }
 0x155   :  { %342 = dma.done.wait [#allocation4], 256  }
 0x156   :  { %343 = vsyncadd [#allocation4], 4294967040 }
 0x157   :  { %195 = vsyncpa [#allocation3], 1 }
 0x158   :  { %196 = vsyncpa [#allocation6], 1 }
 0x159   :  { %197 = vsyncpa [#allocation4], 1 }

</bundles_post_ra>
